<compile_context>
chip_gen: v5e
topology: v5e:2x2
jax: 0.10.0
libtpu: 0.0.40
codegen_flags: <defaults>
</compile_context>

<pallas_src>
import functools

import jax
import jax.numpy as jnp
from jax.experimental import pallas as pl
from jax.experimental.pallas import tpu as pltpu


LANE = 128          # lane width: pad the class dimension up to this
SUBLANE = 8         # sublane granularity for the row tile


def _round_up(a, m):
    return (a + m - 1) // m * m


def _head_kernel(seed_ref, x_ref, w_ref, b_ref, o_ref, *, keep_threshold):
    """One batch tile: (optional dropout) -> x @ W^T (scale pre-folded) + b -> ReLU."""
    x = x_ref[...]                                   # (TM, H), native dtype

    if keep_threshold is not None:
        # Inverted dropout, PyTorch semantics. Keep prob = 1 - p; the 1/(1-p) scale is
        # already folded into w on the host, so only compare + select happens here.
        tm, h = x.shape
        rows = jax.lax.broadcasted_iota(jnp.int32, (tm, h), 0) + pl.program_id(0) * tm
        cols = jax.lax.broadcasted_iota(jnp.int32, (tm, h), 1)
        idx = (rows * h + cols).astype(jnp.uint32)
        seed = seed_ref[0].astype(jnp.uint32)
        # Integer hash (PCG/xxhash-style finalizer) — plain VPU ops, no pltpu PRNG.
        v = idx + seed * jnp.uint32(0x9E3779B9)
        v = v ^ (v >> jnp.uint32(16))
        v = v * jnp.uint32(0x7FEB352D)
        v = v ^ (v >> jnp.uint32(15))
        v = v * jnp.uint32(0x846CA68B)
        v = v ^ (v >> jnp.uint32(16))
        bits = (v >> jnp.uint32(9)).astype(jnp.int32)       # uniform in [0, 2^23)
        keep = bits >= jnp.int32(keep_threshold)
        x = jnp.where(keep, x, jnp.zeros_like(x))

    out = jnp.dot(x, w_ref[...], preferred_element_type=jnp.float32)
    out = out + b_ref[...].astype(jnp.float32)
    o_ref[...] = jnp.maximum(out, 0.0).astype(o_ref.dtype)   # ReLU


class BertClassifierHeadPallas:
    """JAX/Pallas re-implementation of BertClassifier's head:
       pooled_output -> Dropout(p) -> Linear(768, number_classes) -> ReLU.
    """

    def __init__(self, dropout=0.5, number_classes=20, hidden_dim=768, seed=0):
        assert dropout is None or 0.0 <= dropout < 1.0
        self.dropout = dropout
        self.number_classes = number_classes
        self.hidden_dim = hidden_dim
        self.l_pad = _round_up(number_classes, LANE)

        # PyTorch Linear default init: U(-k, k), k = 1/sqrt(fan_in).
        k = 1.0 / (hidden_dim ** 0.5)
        kw, kb = jax.random.split(jax.random.PRNGKey(seed))
        w_t = jax.random.uniform(kw, (hidden_dim, number_classes), jnp.float32,
                                 minval=-k, maxval=k)
        b = jax.random.uniform(kb, (1, number_classes), jnp.float32,
                               minval=-k, maxval=k)
        # Lane-dense (128-padded) parameter layout; padded columns are zero and
        # get sliced off after the kernel.
        self.w_t_pad = jnp.pad(w_t, ((0, 0), (0, self.l_pad - number_classes)))
        self.b_pad = jnp.pad(b, ((0, 0), (0, self.l_pad - number_classes)))

    def __call__(self, pooled_output, training=False, dropout_seed=0):
        n, h = pooled_output.shape
        assert h == self.hidden_dim

        # Row tile: big enough to amortize per-step overhead (~0.35 us/step), small
        # enough to stay well inside every generation's scoped-VMEM default when
        # double-buffered (TM=1024 f32 rows of 768 -> 3 MiB per input buffer).
        tm = min(1024, _round_up(n, SUBLANE))
        n_pad = _round_up(n, tm)
        x = pooled_output
        if n_pad > n:
            x = jnp.pad(x, ((0, n_pad - n), (0, 0)))

        use_dropout = training and (self.dropout is not None) and (self.dropout > 0.0)
        if use_dropout:
            keep_threshold = int(round(self.dropout * float(1 << 23)))
            w = self.w_t_pad * jnp.float32(1.0 / (1.0 - self.dropout))
        else:
            keep_threshold = None
            w = self.w_t_pad
        # Feed weights in the feature dtype (bf16 features -> bf16 weights halves
        # HBM read traffic; MXU consumes bf16 natively, accumulation stays f32).
        w = w.astype(x.dtype)

        kernel = functools.partial(_head_kernel, keep_threshold=keep_threshold)
        seed_arr = jnp.asarray([dropout_seed], dtype=jnp.int32)
        grid = (n_pad // tm,)

        out = pl.pallas_call(
            kernel,
            out_shape=jax.ShapeDtypeStruct((n_pad, self.l_pad), jnp.float32),
            grid_spec=pltpu.PrefetchScalarGridSpec(
                num_scalar_prefetch=1,
                grid=grid,
                in_specs=[
                    pl.BlockSpec((tm, h), lambda i, s: (i, 0)),            # x tile
                    pl.BlockSpec((h, self.l_pad), lambda i, s: (0, 0)),    # W^T (pinned)
                    pl.BlockSpec((1, self.l_pad), lambda i, s: (0, 0)),    # bias (pinned)
                ],
                out_specs=pl.BlockSpec((tm, self.l_pad), lambda i, s: (i, 0)),
            ),
            compiler_params=pltpu.CompilerParams(
                dimension_semantics=("parallel",),
            ),
        )(seed_arr, x, w, self.b_pad)

        return out[:n, :self.number_classes]


if __name__ == "__main__":
    # Small shapes consistent with the module: pooled_output is [batch, 768].
    batch, hidden_dim, num_classes = 16, 768, 20

    key = jax.random.PRNGKey(0)
    pooled_output = jax.random.normal(key, (batch, hidden_dim), dtype=jnp.float32)

    model = BertClassifierHeadPallas(dropout=0.5, number_classes=num_classes,
                                     hidden_dim=hidden_dim, seed=0)

    # 1) eval path (dropout inactive) — deterministic check vs pure-JAX reference.
    out = jax.block_until_ready(model(pooled_output, training=False))
    w_ref = model.w_t_pad[:, :num_classes]
    b_ref = model.b_pad[:, :num_classes]
    ref = jnp.maximum(
        jnp.dot(pooled_output, w_ref, preferred_element_type=jnp.float32) + b_ref, 0.0)
    assert out.shape == (batch, num_classes)
    assert jnp.allclose(out, ref, atol=2e-2, rtol=2e-2), "mismatch vs reference"

    # 2) train path (stochastic dropout, deterministic given seed) — run + sanity-check.
    out_do = jax.block_until_ready(model(pooled_output, training=True, dropout_seed=123))
    assert out_do.shape == (batch, num_classes)
    assert bool(jnp.all(out_do >= 0.0))          # ReLU output is non-negative
    assert bool(jnp.any(out_do != out))          # dropout actually perturbed the output

    print("KERNEL_OK")
</pallas_src>

<mosaic_0001>
module attributes {stable_mosaic.version = 11 : i64} {
  func.func @_head_kernel(%arg0: i32, %arg1: memref<1xi32, #tpu.memory_space<smem>>, %arg2: memref<16x768xf32, #tpu.memory_space<vmem>>, %arg3: memref<768x128xf32, #tpu.memory_space<vmem>>, %arg4: memref<1x128xf32, #tpu.memory_space<vmem>>, %arg5: memref<16x128xf32, #tpu.memory_space<vmem>>) attributes {dimension_semantics = [#tpu.dimension_semantics<parallel>], iteration_bounds = array<i64: 1>, scalar_prefetch = 1 : i64, scratch_operands = 0 : i64, tpu.core_type = #tpu.core_type<tc>, window_params = [{transform_indices = @transform_0, window_bounds = array<i64: 16, 768>}, {pipeline_mode = #tpu.pipeline_mode<synchronous>, transform_indices = @transform_1, window_bounds = array<i64: 768, 128>}, {pipeline_mode = #tpu.pipeline_mode<synchronous>, transform_indices = @transform_2, window_bounds = array<i64: 1, 128>}, {transform_indices = @transform_3, window_bounds = array<i64: 16, 128>}]} {
    %c0 = arith.constant 0 : index
    %c0_0 = arith.constant 0 : index
    %0 = vector.load %arg2[%c0, %c0_0] : memref<16x768xf32, #tpu.memory_space<vmem>>, vector<16x768xf32>
    %c0_1 = arith.constant 0 : index
    %c0_2 = arith.constant 0 : index
    %1 = vector.load %arg3[%c0_1, %c0_2] : memref<768x128xf32, #tpu.memory_space<vmem>>, vector<768x128xf32>
    %cst = arith.constant dense<0.000000e+00> : vector<16x128xf32>
    %2 = tpu.matmul %0, %1, %cst {dimension_numbers = #tpu.dot_dimension_numbers<[1], [0], [0], [1], [0, 0, 1, 1], [], []>} : vector<16x768xf32>, vector<768x128xf32>, vector<16x128xf32> -> vector<16x128xf32>
    %c0_3 = arith.constant 0 : index
    %c0_4 = arith.constant 0 : index
    %3 = vector.load %arg4[%c0_3, %c0_4] : memref<1x128xf32, #tpu.memory_space<vmem>>, vector<1x128xf32>
    %4 = vector.broadcast %3 : vector<1x128xf32> to vector<16x128xf32>
    %5 = arith.addf %2, %4 : vector<16x128xf32>
    %cst_5 = arith.constant 0.000000e+00 : f32
    %6 = vector.broadcast %cst_5 : f32 to vector<16x128xf32>
    %7 = arith.maximumf %5, %6 : vector<16x128xf32>
    %c0_6 = arith.constant 0 : index
    %c0_7 = arith.constant 0 : index
    %8 = vector.load %arg5[%c0_6, %c0_7] : memref<16x128xf32, #tpu.memory_space<vmem>>, vector<16x128xf32>
    tpu.vector_store %arg5[%c0_6, %c0_7], %7 {strides = array<i32>} : memref<16x128xf32, #tpu.memory_space<vmem>>, vector<16x128xf32>,
    return
  }
  func.func @transform_0(%arg0: i32, %arg1: memref<1xi32, #tpu.memory_space<smem>>) -> (i32, i32) {
    %c0_i32 = arith.constant 0 : i32
    %c0_i32_0 = arith.constant 0 : i32
    return %arg0, %c0_i32 : i32, i32
  }
  func.func @transform_1(%arg0: i32, %arg1: memref<1xi32, #tpu.memory_space<smem>>) -> (i32, i32) {
    %c0_i32 = arith.constant 0 : i32
    %c0_i32_0 = arith.constant 0 : i32
    %c0_i32_1 = arith.constant 0 : i32
    return %c0_i32, %c0_i32_0 : i32, i32
  }
  func.func @transform_2(%arg0: i32, %arg1: memref<1xi32, #tpu.memory_space<smem>>) -> (i32, i32) {
    %c0_i32 = arith.constant 0 : i32
    %c0_i32_0 = arith.constant 0 : i32
    %c0_i32_1 = arith.constant 0 : i32
    return %c0_i32, %c0_i32_0 : i32, i32
  }
  func.func @transform_3(%arg0: i32, %arg1: memref<1xi32, #tpu.memory_space<smem>>) -> (i32, i32) {
    %c0_i32 = arith.constant 0 : i32
    %c0_i32_0 = arith.constant 0 : i32
    return %arg0, %c0_i32 : i32, i32
  }
}

</mosaic_0001>

<bundles_post_ra>
// kernel: tpu_custom_call.1
= control target key start
LH: loop header
LB: loop body
LE: loop exit
PB: predicated region body
PF: predicated region fallthrough
CT: control target
= control target key end

     0   :  { %10 = vsyncpa [#allocation5], 0  ;;  %s491_s0 = inlined_call_operand.<no memory space> [shape: s32[1], index: 0, kind: input, shape index: {}]   ;;  %s492_s1 = inlined_call_operand.hbm [shape: f32[16,768], index: 1, kind: input, shape index: {}]   ;;  %s493_s2 = inlined_call_operand.hbm [shape: f32[768,128], index: 2, kind: input, shape index: {}]   ;;  %s494_s3 = inlined_call_operand.vmem [shape: f32[1,128], index: 3, kind: input, shape index: {}]   ;;  %s495_s4 = inlined_call_operand.hbm [shape: f32[16,128], index: 4, kind: output, shape index: {}]  }
   0x1   :  { %11 = vsyncpa [#allocation8], 0 }
   0x2   :  { %12 = vsyncpa [#allocation6], 0  ;;  %s17_s17 = sshll.u32 %s492_s1, 4  ;;  %s441_s0 = smov [#allocation4]   ;;  %s18_s17 = int_to_ptr.hbm [resolvable:$true] %s17_s17 }
   0x3   :  { %s19_s18 = sshll.u32 %s441_s0, 4  ;;  %s30_s21 = sshll.u32 %s493_s2, 4  ;;  %s20_s18 = int_to_ptr.vmem [resolvable:$true] %s19_s18  ;;  %s31_s21 = int_to_ptr.hbm [resolvable:$true] %s30_s21 }
   0x4   :  { %s442_s22 = smov 768   ;;  %s443_s23 = smov 48  }
   0x5   :  { %25 = dma.hbm_to_vmem [thread:$0]  %s18_s17, 1536, %s20_s18, [#allocation5], %s442_s22, %s442_s22, %s443_s23  }
   0x6   :  { %s444_s24 = smov [#allocation7]   ;;  %s445_s26 = smov 128  }
   0x7   :  { %s32_s25 = sshll.u32 %s444_s24, 4  ;;  %s446_s27 = smov 8   ;;  %s33_s25 = int_to_ptr.vmem [resolvable:$true] %s32_s25 }
   0x8   :  { %38 = dma.hbm_to_vmem [thread:$0]  %s31_s21, 12288, %s33_s25, [#allocation8], %s445_s26, %s445_s26, %s446_s27  }
   0x9   :  { %435 = dma.done.wait [#allocation5], 1536  }
   0xa   :  { %436 = vsyncadd [#allocation5], 4294965760 }
   0xb   :  { %437 = dma.done.wait [#allocation8], 12288  }
   0xc   :  { %438 = vsyncadd [#allocation8], 4294955008  ;;  %v76_v0 = vld [vmem:[#allocation7 + $0x78] sm:$0xff]  ;;  %v75_v2 = vld [vmem:[#allocation7 + $0x70] sm:$0xff]  ;;  %s309_s5 = sshll.u32 %s495_s4, 4  ;;  %s310_s5 = int_to_ptr.hbm [resolvable:$true] %s309_s5 }
   0xd   :  { %v108_v1 = vld [vmem:[#allocation7 + $0x178] sm:$0xff]  ;;  %161 = vmatpush.msra.mxu0 %v76_v0  ;;  %v107_v4 = vld [vmem:[#allocation7 + $0x170] sm:$0xff]  ;;  %v74_v6 = vld [vmem:[#allocation7 + $0x68] sm:$0xff] }
   0xe   :  { %207 = vmatpush.msra.mxu2 %v108_v1  ;;  %v92_v3 = vld [vmem:[#allocation7 + $0xf8] sm:$0xff]  ;;  %v91_v7 = vld [vmem:[#allocation7 + $0xf0] sm:$0xff]  ;;  %v106_v8 = vld [vmem:[#allocation7 + $0x168] sm:$0xff] }
   0xf   :  { %v124_v5 = vld [vmem:[#allocation7 + $0x1f8] sm:$0xff]  ;;  %184 = vmatpush.msra.mxu1 %v92_v3  ;;  %162 = vmatpush.msra.mxu0 %v75_v2  ;;  %v123_v9 = vld [vmem:[#allocation7 + $0x1f0] sm:$0xff]  ;;  %v90_v10 = vld [vmem:[#allocation7 + $0xe8] sm:$0xff] }
  0x10   :  { %230 = vmatpush.msra.mxu3 %v124_v5  ;;  %208 = vmatpush.msra.mxu2 %v107_v4  ;;  %v73_v11 = vld [vmem:[#allocation7 + $0x60] sm:$0xff]  ;;  %v122_v13 = vld [vmem:[#allocation7 + $0x1e8] sm:$0xff]  ;;  %v72_v16 = vld [vmem:[#allocation7 + $0x58] sm:$0xff] }
  0x11   :  { %185 = vmatpush.msra.mxu1 %v91_v7  ;;  %v105_v12 = vld [vmem:[#allocation7 + $0x160] sm:$0xff]  ;;  %163 = vmatpush.msra.mxu0 %v74_v6  ;;  %v104_v17 = vld [vmem:[#allocation7 + $0x158] sm:$0xff]  ;;  %v71_v20 = vld [vmem:[#allocation7 + $0x50] sm:$0xff] }
  0x12   :  { %231 = vmatpush.msra.mxu3 %v123_v9  ;;  %209 = vmatpush.msra.mxu2 %v106_v8  ;;  %v89_v14 = vld [vmem:[#allocation7 + $0xe0] sm:$0xff]  ;;  %v88_v18 = vld [vmem:[#allocation7 + $0xd8] sm:$0xff]  ;;  %v103_v21 = vld [vmem:[#allocation7 + $0x150] sm:$0xff] }
  0x13   :  { %v121_v15 = vld [vmem:[#allocation7 + $0x1e0] sm:$0xff]  ;;  %186 = vmatpush.msra.mxu1 %v90_v10  ;;  %164 = vmatpush.msra.mxu0 %v73_v11  ;;  %v120_v19 = vld [vmem:[#allocation7 + $0x1d8] sm:$0xff]  ;;  %v87_v22 = vld [vmem:[#allocation7 + $0xd0] sm:$0xff] }
  0x14   :  { %232 = vmatpush.msra.mxu3 %v122_v13  ;;  %210 = vmatpush.msra.mxu2 %v105_v12  ;;  %v119_v23 = vld [vmem:[#allocation7 + $0x1d0] sm:$0xff]  ;;  %v70_v24 = vld [vmem:[#allocation7 + $0x48] sm:$0xff]  ;;  %v69_v28 = vld [vmem:[#allocation7 + $0x40] sm:$0xff] }
  0x15   :  { %187 = vmatpush.msra.mxu1 %v89_v14  ;;  %165 = vmatpush.msra.mxu0 %v72_v16  ;;  %v102_v25 = vld [vmem:[#allocation7 + $0x148] sm:$0xff]  ;;  %v101_v29 = vld [vmem:[#allocation7 + $0x140] sm:$0xff]  ;;  %v68_v32 = vld [vmem:[#allocation7 + $0x38] sm:$0xff] }
  0x16   :  { %233 = vmatpush.msra.mxu3 %v121_v15  ;;  %211 = vmatpush.msra.mxu2 %v104_v17  ;;  %v86_v26 = vld [vmem:[#allocation7 + $0xc8] sm:$0xff]  ;;  %v85_v30 = vld [vmem:[#allocation7 + $0xc0] sm:$0xff]  ;;  %v100_v33 = vld [vmem:[#allocation7 + $0x138] sm:$0xff] }
  0x17   :  { %188 = vmatpush.msra.mxu1 %v88_v18  ;;  %166 = vmatpush.msra.mxu0 %v71_v20  ;;  %v118_v27 = vld [vmem:[#allocation7 + $0x1c8] sm:$0xff]  ;;  %v117_v31 = vld [vmem:[#allocation7 + $0x1c0] sm:$0xff]  ;;  %v84_v34 = vld [vmem:[#allocation7 + $0xb8] sm:$0xff] }
  0x18   :  { %234 = vmatpush.msra.mxu3 %v120_v19  ;;  %212 = vmatpush.msra.mxu2 %v103_v21  ;;  %v116_v35 = vld [vmem:[#allocation7 + $0x1b8] sm:$0xff]  ;;  %v67_v36 = vld [vmem:[#allocation7 + $0x30] sm:$0xff]  ;;  %v66_v40 = vld [vmem:[#allocation7 + $0x28] sm:$0xff] }
  0x19   :  { %189 = vmatpush.msra.mxu1 %v87_v22  ;;  %167 = vmatpush.msra.mxu0 %v70_v24  ;;  %v99_v37 = vld [vmem:[#allocation7 + $0x130] sm:$0xff]  ;;  %v98_v41 = vld [vmem:[#allocation7 + $0x128] sm:$0xff]  ;;  %v65_v44 = vld [vmem:[#allocation7 + $0x20] sm:$0xff] }
  0x1a   :  { %235 = vmatpush.msra.mxu3 %v119_v23  ;;  %213 = vmatpush.msra.mxu2 %v102_v25  ;;  %v83_v38 = vld [vmem:[#allocation7 + $0xb0] sm:$0xff]  ;;  %v82_v42 = vld [vmem:[#allocation7 + $0xa8] sm:$0xff]  ;;  %v97_v45 = vld [vmem:[#allocation7 + $0x120] sm:$0xff] }
  0x1b   :  { %190 = vmatpush.msra.mxu1 %v86_v26  ;;  %168 = vmatpush.msra.mxu0 %v69_v28  ;;  %v115_v39 = vld [vmem:[#allocation7 + $0x1b0] sm:$0xff]  ;;  %v114_v43 = vld [vmem:[#allocation7 + $0x1a8] sm:$0xff]  ;;  %v81_v46 = vld [vmem:[#allocation7 + $0xa0] sm:$0xff] }
  0x1c   :  { %236 = vmatpush.msra.mxu3 %v118_v27  ;;  %214 = vmatpush.msra.mxu2 %v101_v29  ;;  %v113_v47 = vld [vmem:[#allocation7 + $0x1a0] sm:$0xff]  ;;  %v64_v48 = vld [vmem:[#allocation7 + $0x18] sm:$0xff]  ;;  %v63_v52 = vld [vmem:[#allocation7 + $0x10] sm:$0xff] }
  0x1d   :  { %191 = vmatpush.msra.mxu1 %v85_v30  ;;  %169 = vmatpush.msra.mxu0 %v68_v32  ;;  %v96_v49 = vld [vmem:[#allocation7 + $0x118] sm:$0xff]  ;;  %v95_v53 = vld [vmem:[#allocation7 + $0x110] sm:$0xff]  ;;  %v62_v56 = vld [vmem:[#allocation7 + $0x8] sm:$0xff] }
  0x1e   :  { %237 = vmatpush.msra.mxu3 %v117_v31  ;;  %215 = vmatpush.msra.mxu2 %v100_v33  ;;  %v80_v50 = vld [vmem:[#allocation7 + $0x98] sm:$0xff]  ;;  %v79_v54 = vld [vmem:[#allocation7 + $0x90] sm:$0xff]  ;;  %v94_v57 = vld [vmem:[#allocation7 + $0x108] sm:$0xff] }
  0x1f   :  { %192 = vmatpush.msra.mxu1 %v84_v34  ;;  %170 = vmatpush.msra.mxu0 %v67_v36  ;;  %v112_v51 = vld [vmem:[#allocation7 + $0x198] sm:$0xff]  ;;  %v111_v55 = vld [vmem:[#allocation7 + $0x190] sm:$0xff]  ;;  %v78_v58 = vld [vmem:[#allocation7 + $0x88] sm:$0xff] }
  0x20   :  { %238 = vmatpush.msra.mxu3 %v116_v35  ;;  %216 = vmatpush.msra.mxu2 %v99_v37  ;;  %v110_v59 = vld [vmem:[#allocation7 + $0x188] sm:$0xff]  ;;  %v61_v60 = vld [vmem:[#allocation7] sm:$0xff]  ;;  %v140_v62 = vld [vmem:[#allocation7 + $0x278] sm:$0xff] }
  0x21   :  { %193 = vmatpush.msra.mxu1 %v83_v38  ;;  %171 = vmatpush.msra.mxu0 %v66_v40  ;;  %v93_v61 = vld [vmem:[#allocation7 + $0x100] sm:$0xff]  ;;  %v139_v1 = vld [vmem:[#allocation7 + $0x270] sm:$0xff]  ;;  %v156_v2 = vld [vmem:[#allocation7 + $0x2f8] sm:$0xff] }
  0x22   :  { %239 = vmatpush.msra.mxu3 %v115_v39  ;;  %217 = vmatpush.msra.mxu2 %v98_v41  ;;  %v77_v63 = vld [vmem:[#allocation7 + $0x80] sm:$0xff]  ;;  %v138_v3 = vld [vmem:[#allocation7 + $0x268] sm:$0xff]  ;;  %v155_v4 = vld [vmem:[#allocation7 + $0x2f0] sm:$0xff] }
  0x23   :  { %194 = vmatpush.msra.mxu1 %v82_v42  ;;  %172 = vmatpush.msra.mxu0 %v65_v44  ;;  %v109_v0 = vld [vmem:[#allocation7 + $0x180] sm:$0xff]  ;;  %v154_v6 = vld [vmem:[#allocation7 + $0x2e8] sm:$0xff]  ;;  %v136_v7 = vld [vmem:[#allocation7 + $0x258] sm:$0xff] }
  0x24   :  { %240 = vmatpush.msra.mxu3 %v114_v43  ;;  %218 = vmatpush.msra.mxu2 %v97_v45  ;;  %v137_v5 = vld [vmem:[#allocation7 + $0x260] sm:$0xff]  ;;  %v135_v9 = vld [vmem:[#allocation7 + $0x250] sm:$0xff]  ;;  %v152_v10 = vld [vmem:[#allocation7 + $0x2d8] sm:$0xff] }
  0x25   :  { %195 = vmatpush.msra.mxu1 %v81_v46  ;;  %173 = vmatpush.msra.mxu0 %v64_v48  ;;  %v153_v8 = vld [vmem:[#allocation7 + $0x2e0] sm:$0xff]  ;;  %v134_v11 = vld [vmem:[#allocation7 + $0x248] sm:$0xff]  ;;  %v151_v12 = vld [vmem:[#allocation7 + $0x2d0] sm:$0xff] }
  0x26   :  { %241 = vmatpush.msra.mxu3 %v113_v47  ;;  %219 = vmatpush.msra.mxu2 %v96_v49  ;;  %v133_v13 = vld [vmem:[#allocation7 + $0x240] sm:$0xff]  ;;  %v150_v14 = vld [vmem:[#allocation7 + $0x2c8] sm:$0xff]  ;;  %v51_v16 = vld [vmem:[#allocation4 + $0x10] sm:$0xff] }
  0x27   :  { %196 = vmatpush.msra.mxu1 %v80_v50  ;;  %174 = vmatpush.msra.mxu0 %v63_v52  ;;  %v49_v15 = vld [vmem:[#allocation4] sm:$0xff]  ;;  %v132_v17 = vld [vmem:[#allocation7 + $0x238] sm:$0xff]  ;;  %v50_v19 = vld [vmem:[#allocation4 + $0x8] sm:$0xff] }
  0x28   :  { %242 = vmatpush.msra.mxu3 %v112_v51  ;;  %220 = vmatpush.msra.mxu2 %v95_v53  ;;  %v149_v18 = vld [vmem:[#allocation7 + $0x2c0] sm:$0xff]  ;;  %v52_v20 = vld [vmem:[#allocation4 + $0x18] sm:$0xff]  ;;  %v131_v21 = vld [vmem:[#allocation7 + $0x230] sm:$0xff] }
  0x29   :  { %197 = vmatpush.msra.mxu1 %v79_v54  ;;  %175 = vmatpush.msra.mxu0 %v62_v56  ;;  %v148_v22 = vld [vmem:[#allocation7 + $0x2b8] sm:$0xff]  ;;  %v130_v23 = vld [vmem:[#allocation7 + $0x228] sm:$0xff]  ;;  %v147_v24 = vld [vmem:[#allocation7 + $0x2b0] sm:$0xff] }
  0x2a   :  { %243 = vmatpush.msra.mxu3 %v111_v55  ;;  %221 = vmatpush.msra.mxu2 %v94_v57  ;;  %v129_v25 = vld [vmem:[#allocation7 + $0x220] sm:$0xff]  ;;  %v146_v26 = vld [vmem:[#allocation7 + $0x2a8] sm:$0xff]  ;;  %v55_v27 = vld [vmem:[#allocation4 + $0x30] sm:$0xff] }
  0x2b   :  { %198 = vmatpush.msra.mxu1 %v78_v58  ;;  %176 = vmatpush.msra.mxu0 %v61_v60  ;;  %v57_v28 = vld [vmem:[#allocation4 + $0x40] sm:$0xff]  ;;  %v128_v29 = vld [vmem:[#allocation7 + $0x218] sm:$0xff]  ;;  %v58_v32 = vld [vmem:[#allocation4 + $0x48] sm:$0xff] }
  0x2c   :  { %244 = vmatpush.msra.mxu3 %v110_v59  ;;  %222 = vmatpush.msra.mxu2 %v93_v61  ;;  %v145_v30 = vld [vmem:[#allocation7 + $0x2a0] sm:$0xff]  ;;  %v56_v31 = vld [vmem:[#allocation4 + $0x38] sm:$0xff]  ;;  %v127_v33 = vld [vmem:[#allocation7 + $0x210] sm:$0xff] }
  0x2d   :  { %253 = vmatpush.msrb.mxu0 %v140_v62  ;;  %199 = vmatpush.msra.mxu1 %v77_v63  ;;  %v144_v34 = vld [vmem:[#allocation7 + $0x298] sm:$0xff]  ;;  %v126_v35 = vld [vmem:[#allocation7 + $0x208] sm:$0xff]  ;;  %v143_v36 = vld [vmem:[#allocation7 + $0x290] sm:$0xff] }
  0x2e   :  { %323 = vmatpush.msrb.mxu2 %v140_v62  ;;  %245 = vmatpush.msra.mxu3 %v109_v0  ;;  %v125_v37 = vld [vmem:[#allocation7 + $0x200] sm:$0xff]  ;;  %v142_v38 = vld [vmem:[#allocation7 + $0x288] sm:$0xff]  ;;  %v59_v40 = vld [vmem:[#allocation4 + $0x50] sm:$0xff] }
  0x2f   :  { %254 = vmatpush.msrb.mxu0 %v139_v1  ;;  %276 = vmatpush.msrb.mxu1 %v156_v2  ;;  %v53_v39 = vld [vmem:[#allocation4 + $0x20] sm:$0xff]  ;;  %v54_v42 = vld [vmem:[#allocation4 + $0x28] sm:$0xff]  ;;  %v60_v43 = vld [vmem:[#allocation4 + $0x58] sm:$0xff] }
  0x30   :  { %324 = vmatpush.msrb.mxu2 %v139_v1  ;;  %339 = vmatpush.msrb.mxu3 %v156_v2  ;;  %v141_v41 = vld [vmem:[#allocation7 + $0x280] sm:$0xff] }
  0x31   :  { %255 = vmatpush.msrb.mxu0 %v138_v3  ;;  %277 = vmatpush.msrb.mxu1 %v155_v4  ;;  %v362_v45 = vld [vmem:[%s494_s3] ss:$0 sm:$0xff]  ;;  %s447_s3 = smov [#allocation9]  }
  0x32   :  { %325 = vmatpush.msrb.mxu2 %v138_v3  ;;  %340 = vmatpush.msrb.mxu3 %v155_v4  ;;  %s307_s28 = sshll.u32 %s447_s3, 4  ;;  %s308_s28 = int_to_ptr.vmem [resolvable:$true] %s307_s28 }
  0x33   :  { %256 = vmatpush.msrb.mxu0 %v137_v5  ;;  %278 = vmatpush.msrb.mxu1 %v154_v6 }
  0x34   :  { %326 = vmatpush.msrb.mxu2 %v137_v5  ;;  %341 = vmatpush.msrb.mxu3 %v154_v6 }
  0x35   :  { %257 = vmatpush.msrb.mxu0 %v136_v7  ;;  %279 = vmatpush.msrb.mxu1 %v153_v8 }
  0x36   :  { %327 = vmatpush.msrb.mxu2 %v136_v7  ;;  %342 = vmatpush.msrb.mxu3 %v153_v8 }
  0x37   :  { %258 = vmatpush.msrb.mxu0 %v135_v9  ;;  %280 = vmatpush.msrb.mxu1 %v152_v10 }
  0x38   :  { %328 = vmatpush.msrb.mxu2 %v135_v9  ;;  %343 = vmatpush.msrb.mxu3 %v152_v10 }
  0x39   :  { %259 = vmatpush.msrb.mxu0 %v134_v11  ;;  %281 = vmatpush.msrb.mxu1 %v151_v12 }
  0x3a   :  { %329 = vmatpush.msrb.mxu2 %v134_v11  ;;  %344 = vmatpush.msrb.mxu3 %v151_v12 }
  0x3b   :  { %260 = vmatpush.msrb.mxu0 %v133_v13  ;;  %282 = vmatpush.msrb.mxu1 %v150_v14 }
  0x3c   :  { %330 = vmatpush.msrb.mxu2 %v133_v13  ;;  %345 = vmatpush.msrb.mxu3 %v150_v14 }
  0x3d   :  { %177 = vmatmul.f32.vlgmr.msra.gmra.mxu0 %v49_v15  ;;  %223 = vmatmul.f32.vlgmr.msra.gmra.mxu2 %v51_v16 }
  0x3e   :  { %261 = vmatpush.msrb.mxu0 %v132_v17  ;;  %331 = vmatpush.msrb.mxu2 %v132_v17 }
  0x3f   :  { %283 = vmatpush.msrb.mxu1 %v149_v18  ;;  %346 = vmatpush.msrb.mxu3 %v149_v18 }
  0x40   :  { %200 = vmatmul.f32.vlgmr.msra.gmra.mxu1 %v50_v19  ;;  %246 = vmatmul.f32.vlgmr.msra.gmra.mxu3 %v52_v20 }
  0x41   :  { %262 = vmatpush.msrb.mxu0 %v131_v21  ;;  %332 = vmatpush.msrb.mxu2 %v131_v21 }
  0x42   :  { %284 = vmatpush.msrb.mxu1 %v148_v22  ;;  %347 = vmatpush.msrb.mxu3 %v148_v22 }
  0x43   :  { %263 = vmatpush.msrb.mxu0 %v130_v23  ;;  %333 = vmatpush.msrb.mxu2 %v130_v23 }
  0x44   :  { %285 = vmatpush.msrb.mxu1 %v147_v24  ;;  %348 = vmatpush.msrb.mxu3 %v147_v24 }
  0x45   :  { %264 = vmatpush.msrb.mxu0 %v129_v25  ;;  %334 = vmatpush.msrb.mxu2 %v129_v25 }
  0x46   :  { %286 = vmatpush.msrb.mxu1 %v146_v26  ;;  %349 = vmatpush.msrb.mxu3 %v146_v26 }
  0x47   :  { %180 = vmatmul.f32.gmra.mxu0 %v55_v27  ;;  %226 = vmatmul.f32.gmra.mxu2 %v57_v28 }
  0x48   :  { %265 = vmatpush.msrb.mxu0 %v128_v29  ;;  %335 = vmatpush.msrb.mxu2 %v128_v29 }
  0x49   :  { %287 = vmatpush.msrb.mxu1 %v145_v30  ;;  %350 = vmatpush.msrb.mxu3 %v145_v30 }
  0x4a   :  { %203 = vmatmul.f32.gmra.mxu1 %v56_v31  ;;  %249 = vmatmul.f32.gmra.mxu3 %v58_v32 }
  0x4b   :  { %266 = vmatpush.msrb.mxu0 %v127_v33  ;;  %336 = vmatpush.msrb.mxu2 %v127_v33 }
  0x4c   :  { %288 = vmatpush.msrb.mxu1 %v144_v34  ;;  %351 = vmatpush.msrb.mxu3 %v144_v34 }
  0x4d   :  { %267 = vmatpush.msrb.mxu0 %v126_v35  ;;  %337 = vmatpush.msrb.mxu2 %v126_v35 }
  0x4e   :  { %289 = vmatpush.msrb.mxu1 %v143_v36  ;;  %352 = vmatpush.msrb.mxu3 %v143_v36 }
  0x4f   :  { %268 = vmatpush.msrb.mxu0 %v125_v37  ;;  %338 = vmatpush.msrb.mxu2 %v125_v37 }
  0x50   :  { %290 = vmatpush.msrb.mxu1 %v142_v38  ;;  %353 = vmatpush.msrb.mxu3 %v142_v38 }
  0x51   :  { %269 = vmatmul.f32.vlgmr.msrb.gmra.mxu0 %v53_v39  ;;  %272 = vmatmul.f32.vlgmr.msrb.gmra.mxu2 %v59_v40 }
  0x52   :  { %291 = vmatpush.msrb.mxu1 %v141_v41  ;;  %354 = vmatpush.msrb.mxu3 %v141_v41 }
  0x53   :  { %292 = vmatmul.f32.vlgmr.msrb.gmra.mxu1 %v54_v42  ;;  %295 = vmatmul.f32.vlgmr.msrb.gmra.mxu3 %v60_v43 }
  0xba   :  { %v178_v44 = vpop.f32.mrf.mxu0 }
  0xbb   :  { %v179_v48 = vadd.f32 %v362_v45, %v178_v44 }
  0xbd   :  { %v201_v46 = vpop.f32.mrf.mxu1 }
  0xbe   :  { %v202_v51 = vadd.f32 %v201_v46, %v179_v48 }
  0xc0   :  { %v224_v47 = vpop.f32.mrf.mxu2 }
  0xc1   :  { %v225_v54 = vadd.f32 %v224_v47, %v202_v51 }
  0xc3   :  { %v247_v49 = vpop.f32.mrf.mxu3 }
  0xc4   :  { %v181_v50 = vpop.f32.mrf.mxu0  ;;  %v248_v57 = vadd.f32 %v247_v49, %v225_v54 }
  0xc5   :  { %v182_v52 = vadd.f32 %v362_v45, %v181_v50 }
  0xc7   :  { %v204_v53 = vpop.f32.mrf.mxu1 }
  0xc8   :  { %v205_v56 = vadd.f32 %v204_v53, %v182_v52 }
  0xca   :  { %v227_v55 = vpop.f32.mrf.mxu2 }
  0xcb   :  { %v228_v60 = vadd.f32 %v227_v55, %v205_v56 }
  0xcd   :  { %v250_v58 = vpop.f32.mrf.mxu3 }
  0xce   :  { %v270_v59 = vpop.f32.mrf.mxu0  ;;  %v251_v0 = vadd.f32 %v250_v58, %v228_v60 }
  0xcf   :  { %v271_v61 = vadd.f32 %v270_v59, %v248_v57 }
  0xd0   :  { %v293_v62 = vpop.f32.mrf.mxu1 }
  0xd1   :  { %v294_v63 = vadd.f32 %v293_v62, %v271_v61 }
  0xd3   :  { %v299_v1 = vmax.f32 %v294_v63, 0.0 }
  0xd4   :  { %v273_v2 = vpop.f32.mrf.mxu2 }
  0xd5   :  { %301 = vst [vmem:[#allocation9] sm:$0xff] %v299_v1  ;;  %v274_v3 = vadd.f32 %v273_v2, %v251_v0 }
  0xd6   :  { %v296_v4 = vpop.f32.mrf.mxu3 }
  0xd7   :  { %v297_v5 = vadd.f32 %v296_v4, %v274_v3 }
  0xd9   :  { %v300_v6 = vmax.f32 %v297_v5, 0.0 }
  0xdb   :  { %302 = vst [vmem:[#allocation9 + $0x8] sm:$0xff] %v300_v6 }
  0xdc   :  { %315 = dma.vmem_to_hbm [thread:$0]  %s308_s28, 256, %s310_s5, [#allocation6], %s445_s26, %s445_s26, %s446_s27  }
  0xdd   :  { %439 = dma.done.wait [#allocation6], 256  }
  0xde   :  { %440 = vsyncadd [#allocation6], 4294967040 }
  0xdf   :  { %320 = vsyncpa [#allocation5], 1 }
  0xe0   :  { %321 = vsyncpa [#allocation8], 1 }
  0xe1   :  { %322 = vsyncpa [#allocation6], 1 }

</bundles_post_ra>
